<compile_context>
chip_gen: v6e
topology: v6e:2x2x1
jax: 0.10.0
libtpu: 0.0.40
codegen_flags: <defaults>
</compile_context>

<pallas_src>
import functools

import jax
import jax.numpy as jnp
from jax.experimental import pallas as pl
from jax.experimental.pallas import tpu as pltpu

IN_DIM = 3
H1 = 64
H2 = 64
OUT_DIM = 1


def _mlp_kernel(x_ref, w1_ref, b1_ref, w2_ref, b2_ref, w3_ref, b3_ref, o_ref):
    # Batch-major layout: activations are [batch_tile, features]; batch sits on
    # the sublane axis, so no transpose is ever needed on the input or output.
    x = x_ref[...]                                   # [tile, 3]
    w1 = w1_ref[...]                                 # [3, 64]  (fc1.weight.T)

    # Layer 1 on the VPU: K=3 is far too shallow for the MXU.
    h = (x[:, 0:1] * w1[0:1, :]
         + x[:, 1:2] * w1[1:2, :]
         + x[:, 2:3] * w1[2:3, :]
         + b1_ref[...])                              # [tile, 64]
    h = jnp.maximum(h, 0.0)

    # Layer 2 on the MXU: the only well-shaped matmul (64x64 contraction).
    h = jnp.dot(h, w2_ref[...], preferred_element_type=jnp.float32)
    h = jnp.maximum(h + b2_ref[...], 0.0)            # [tile, 64]

    # Layer 3 on VPU + XLU: M=1 would waste 127/128 of the MXU rows.
    out = jnp.sum(h * w3_ref[...], axis=1, keepdims=True) + b3_ref[...]
    o_ref[...] = out.astype(o_ref.dtype)             # [tile, 1]


def _round_up(x, m):
    return -(-x // m) * m


def _cdiv(a, b):
    return -(-a // b)


def _num_tensorcores():
    """Best-effort TensorCore count per device (v7x / megacore -> 2)."""
    try:
        kind = jax.devices()[0].device_kind.lower()
    except Exception:  # no device info -> conservative single-core plan
        return 1
    if "lite" in kind or "v5e" in kind or "v6" in kind:
        return 1
    if "v4" in kind or "v5p" in kind or "7" in kind:
        return 2
    return 1


def _choose_tile(batch, block_b, n_cores):
    """Batch tile (multiple of 128 rows), capped at block_b.

    Single-TC chips (v5e/v6e): one maximal tile (extra grid steps only add
    ~0.35us each with zero parallelism benefit).  2-TC chips (v7x/megacore):
    aim for an even number of 'parallel' grid steps so both cores stay busy.
    """
    gran = 128
    block_b = max(gran, (block_b // gran) * gran)
    need = _round_up(max(batch, 1), gran)
    if n_cores > 1 and need > gran:
        steps = max(2, _round_up(_cdiv(need, block_b), 2))
        tile = _round_up(_cdiv(need, steps), gran)
        return min(tile, block_b)
    return min(block_b, need)


@functools.partial(jax.jit, static_argnames=("block_b",))
def simple_net_forward(x, params, *, block_b=2048):
    """x: [B, 3] float32 -> [B, 1] float32 (PyTorch SimpleNet forward)."""
    w1t, b1, w2t, b2, w3, b3 = params
    B = x.shape[0]

    n_cores = _num_tensorcores()
    tile = _choose_tile(B, block_b, n_cores)
    padded_B = _round_up(B, tile)
    grid = (padded_B // tile,)

    # Only host-side op: pad the batch dim when it does not divide the tile.
    x_in = x if padded_B == B else jnp.pad(x, ((0, padded_B - B), (0, 0)))

    flops = 2 * padded_B * (IN_DIM * H1 + H1 * H2 + H2 * OUT_DIM)
    bytes_accessed = 4 * (
        padded_B * IN_DIM + padded_B * OUT_DIM
        + IN_DIM * H1 + H1 + H1 * H2 + H2 + H2 * OUT_DIM + OUT_DIM
    )

    # Weights/biases are tiny: constant (0, 0) block index keeps them resident
    # in VMEM across all grid steps.
    def full(shape):
        return pl.BlockSpec(shape, lambda i: (0, 0))

    out = pl.pallas_call(
        _mlp_kernel,
        out_shape=jax.ShapeDtypeStruct((padded_B, OUT_DIM), jnp.float32),
        grid=grid,
        in_specs=[
            pl.BlockSpec((tile, IN_DIM), lambda i: (i, 0)),  # x tile [tile, 3]
            full((IN_DIM, H1)),     # w1.T  [3, 64]
            full((1, H1)),          # b1    [1, 64]
            full((H1, H2)),         # w2.T  [64, 64]
            full((1, H2)),          # b2    [1, 64]
            full((OUT_DIM, H2)),    # w3    [1, 64]  (PyTorch-native [out, in])
            full((1, OUT_DIM)),     # b3    [1, 1]
        ],
        out_specs=pl.BlockSpec((tile, OUT_DIM), lambda i: (i, 0)),
        compiler_params=pltpu.CompilerParams(
            dimension_semantics=("parallel",),
            vmem_limit_bytes=32 * 1024 * 1024,
        ),
        cost_estimate=pl.CostEstimate(
            flops=flops, transcendentals=0, bytes_accessed=bytes_accessed
        ),
    )(x_in, w1t, b1, w2t, b2, w3, b3)

    return out if padded_B == B else out[:B]


def init_params(key):
    """Deterministic init mimicking nn.Linear's U(-1/sqrt(fan_in), ...).

    Stored in kernel-native layout (transposed weights / row biases) so the
    forward pass has zero per-call layout ops:
      w1t = fc1.weight.T [3, 64],  b1 [1, 64]
      w2t = fc2.weight.T [64, 64], b2 [1, 64]
      w3  = fc3.weight   [1, 64],  b3 [1, 1]
    """
    def linear(key, fan_in, fan_out):
        kw, kb = jax.random.split(key)
        bound = 1.0 / jnp.sqrt(fan_in)
        w = jax.random.uniform(kw, (fan_out, fan_in), jnp.float32, -bound, bound)
        b = jax.random.uniform(kb, (fan_out,), jnp.float32, -bound, bound)
        return w, b

    k1, k2, k3 = jax.random.split(key, 3)
    w1, b1 = linear(k1, IN_DIM, H1)
    w2, b2 = linear(k2, H1, H2)
    w3, b3 = linear(k3, H2, OUT_DIM)
    return (w1.T, b1[None, :], w2.T, b2[None, :], w3, b3[None, :])


def reference_forward(x, params):
    w1t, b1, w2t, b2, w3, b3 = params
    h = jnp.maximum(x @ w1t + b1, 0.0)
    h = jnp.maximum(h @ w2t + b2, 0.0)
    return h @ w3.T + b3


if __name__ == "__main__":
    key = jax.random.PRNGKey(0)
    kp, kx = jax.random.split(key)

    params = init_params(kp)
    # Small batch that is not a multiple of the 128-row tile granule, so the
    # host-side pad + output slice paths are exercised.
    B = 10
    x = jax.random.normal(kx, (B, IN_DIM), jnp.float32)

    out = jax.block_until_ready(simple_net_forward(x, params))

    ref = reference_forward(x, params)
    assert out.shape == (B, OUT_DIM)
    assert jnp.allclose(out, ref, atol=1e-4, rtol=1e-5), "mismatch vs. JAX reference"

    print("KERNEL_OK")
</pallas_src>

<mosaic_0001>
module attributes {stable_mosaic.version = 11 : i64} {
  func.func @_mlp_kernel(%arg0: i32, %arg1: memref<128x3xf32, #tpu.memory_space<vmem>>, %arg2: memref<3x64xf32, #tpu.memory_space<vmem>>, %arg3: memref<1x64xf32, #tpu.memory_space<vmem>>, %arg4: memref<64x64xf32, #tpu.memory_space<vmem>>, %arg5: memref<1x64xf32, #tpu.memory_space<vmem>>, %arg6: memref<1x64xf32, #tpu.memory_space<vmem>>, %arg7: memref<1x1xf32, #tpu.memory_space<vmem>>, %arg8: memref<128x1xf32, #tpu.memory_space<vmem>>) attributes {dimension_semantics = [#tpu.dimension_semantics<parallel>], iteration_bounds = array<i64: 1>, scalar_prefetch = 0 : i64, scratch_operands = 0 : i64, tpu.core_type = #tpu.core_type<tc>, window_params = [{transform_indices = @transform_0, window_bounds = array<i64: 128, 3>}, {pipeline_mode = #tpu.pipeline_mode<synchronous>, transform_indices = @transform_1, window_bounds = array<i64: 3, 64>}, {pipeline_mode = #tpu.pipeline_mode<synchronous>, transform_indices = @transform_2, window_bounds = array<i64: 1, 64>}, {pipeline_mode = #tpu.pipeline_mode<synchronous>, transform_indices = @transform_3, window_bounds = array<i64: 64, 64>}, {pipeline_mode = #tpu.pipeline_mode<synchronous>, transform_indices = @transform_4, window_bounds = array<i64: 1, 64>}, {pipeline_mode = #tpu.pipeline_mode<synchronous>, transform_indices = @transform_5, window_bounds = array<i64: 1, 64>}, {pipeline_mode = #tpu.pipeline_mode<synchronous>, transform_indices = @transform_6, window_bounds = array<i64: 1, 1>}, {transform_indices = @transform_7, window_bounds = array<i64: 128, 1>}]} {
    %c0 = arith.constant 0 : index
    %c0_0 = arith.constant 0 : index
    %0 = vector.load %arg1[%c0, %c0_0] : memref<128x3xf32, #tpu.memory_space<vmem>>, vector<128x3xf32>
    %c0_1 = arith.constant 0 : index
    %c0_2 = arith.constant 0 : index
    %1 = vector.load %arg2[%c0_1, %c0_2] : memref<3x64xf32, #tpu.memory_space<vmem>>, vector<3x64xf32>
    %2 = vector.extract_strided_slice %0 {offsets = [0, 0], sizes = [128, 1], strides = [1, 1]} : vector<128x3xf32> to vector<128x1xf32>
    %3 = vector.extract_strided_slice %1 {offsets = [0, 0], sizes = [1, 64], strides = [1, 1]} : vector<3x64xf32> to vector<1x64xf32>
    %4 = vector.broadcast %2 : vector<128x1xf32> to vector<128x64xf32>
    %5 = vector.broadcast %3 : vector<1x64xf32> to vector<128x64xf32>
    %6 = arith.mulf %4, %5 : vector<128x64xf32>
    %7 = vector.extract_strided_slice %0 {offsets = [0, 1], sizes = [128, 1], strides = [1, 1]} : vector<128x3xf32> to vector<128x1xf32>
    %8 = vector.extract_strided_slice %1 {offsets = [1, 0], sizes = [1, 64], strides = [1, 1]} : vector<3x64xf32> to vector<1x64xf32>
    %9 = vector.broadcast %7 : vector<128x1xf32> to vector<128x64xf32>
    %10 = vector.broadcast %8 : vector<1x64xf32> to vector<128x64xf32>
    %11 = arith.mulf %9, %10 : vector<128x64xf32>
    %12 = arith.addf %6, %11 : vector<128x64xf32>
    %13 = vector.extract_strided_slice %0 {offsets = [0, 2], sizes = [128, 1], strides = [1, 1]} : vector<128x3xf32> to vector<128x1xf32>
    %14 = vector.extract_strided_slice %1 {offsets = [2, 0], sizes = [1, 64], strides = [1, 1]} : vector<3x64xf32> to vector<1x64xf32>
    %15 = vector.broadcast %13 : vector<128x1xf32> to vector<128x64xf32>
    %16 = vector.broadcast %14 : vector<1x64xf32> to vector<128x64xf32>
    %17 = arith.mulf %15, %16 : vector<128x64xf32>
    %18 = arith.addf %12, %17 : vector<128x64xf32>
    %c0_3 = arith.constant 0 : index
    %c0_4 = arith.constant 0 : index
    %19 = vector.load %arg3[%c0_3, %c0_4] : memref<1x64xf32, #tpu.memory_space<vmem>>, vector<1x64xf32>
    %20 = vector.broadcast %19 : vector<1x64xf32> to vector<128x64xf32>
    %21 = arith.addf %18, %20 : vector<128x64xf32>
    %cst = arith.constant 0.000000e+00 : f32
    %22 = vector.broadcast %cst : f32 to vector<128x64xf32>
    %23 = arith.maximumf %21, %22 : vector<128x64xf32>
    %c0_5 = arith.constant 0 : index
    %c0_6 = arith.constant 0 : index
    %24 = vector.load %arg4[%c0_5, %c0_6] : memref<64x64xf32, #tpu.memory_space<vmem>>, vector<64x64xf32>
    %cst_7 = arith.constant dense<0.000000e+00> : vector<128x64xf32>
    %25 = tpu.matmul %23, %24, %cst_7 {dimension_numbers = #tpu.dot_dimension_numbers<[1], [0], [0], [1], [0, 0, 1, 1], [], []>} : vector<128x64xf32>, vector<64x64xf32>, vector<128x64xf32> -> vector<128x64xf32>
    %c0_8 = arith.constant 0 : index
    %c0_9 = arith.constant 0 : index
    %26 = vector.load %arg5[%c0_8, %c0_9] : memref<1x64xf32, #tpu.memory_space<vmem>>, vector<1x64xf32>
    %27 = vector.broadcast %26 : vector<1x64xf32> to vector<128x64xf32>
    %28 = arith.addf %25, %27 : vector<128x64xf32>
    %cst_10 = arith.constant 0.000000e+00 : f32
    %29 = vector.broadcast %cst_10 : f32 to vector<128x64xf32>
    %30 = arith.maximumf %28, %29 : vector<128x64xf32>
    %c0_11 = arith.constant 0 : index
    %c0_12 = arith.constant 0 : index
    %31 = vector.load %arg6[%c0_11, %c0_12] : memref<1x64xf32, #tpu.memory_space<vmem>>, vector<1x64xf32>
    %32 = vector.broadcast %31 : vector<1x64xf32> to vector<128x64xf32>
    %33 = arith.mulf %30, %32 : vector<128x64xf32>
    %cst_13 = arith.constant dense<0.000000e+00> : vector<128xf32>
    %34 = vector.multi_reduction <add>, %33, %cst_13 [1] : vector<128x64xf32> to vector<128xf32>
    %35 = vector.shape_cast %34 : vector<128xf32> to vector<128x1xf32>
    %c0_14 = arith.constant 0 : index
    %c0_15 = arith.constant 0 : index
    %36 = vector.load %arg7[%c0_14, %c0_15] : memref<1x1xf32, #tpu.memory_space<vmem>>, vector<1x1xf32>
    %37 = vector.broadcast %36 : vector<1x1xf32> to vector<128x1xf32>
    %38 = arith.addf %35, %37 : vector<128x1xf32>
    %c0_16 = arith.constant 0 : index
    %c0_17 = arith.constant 0 : index
    %39 = vector.load %arg8[%c0_16, %c0_17] : memref<128x1xf32, #tpu.memory_space<vmem>>, vector<128x1xf32>
    tpu.vector_store %arg8[%c0_16, %c0_17], %38 {strides = array<i32>} : memref<128x1xf32, #tpu.memory_space<vmem>>, vector<128x1xf32>,
    return
  }
  func.func @transform_0(%arg0: i32) -> (i32, i32) {
    %c0_i32 = arith.constant 0 : i32
    %c0_i32_0 = arith.constant 0 : i32
    return %arg0, %c0_i32 : i32, i32
  }
  func.func @transform_1(%arg0: i32) -> (i32, i32) {
    %c0_i32 = arith.constant 0 : i32
    %c0_i32_0 = arith.constant 0 : i32
    %c0_i32_1 = arith.constant 0 : i32
    return %c0_i32, %c0_i32_0 : i32, i32
  }
  func.func @transform_2(%arg0: i32) -> (i32, i32) {
    %c0_i32 = arith.constant 0 : i32
    %c0_i32_0 = arith.constant 0 : i32
    %c0_i32_1 = arith.constant 0 : i32
    return %c0_i32, %c0_i32_0 : i32, i32
  }
  func.func @transform_3(%arg0: i32) -> (i32, i32) {
    %c0_i32 = arith.constant 0 : i32
    %c0_i32_0 = arith.constant 0 : i32
    %c0_i32_1 = arith.constant 0 : i32
    return %c0_i32, %c0_i32_0 : i32, i32
  }
  func.func @transform_4(%arg0: i32) -> (i32, i32) {
    %c0_i32 = arith.constant 0 : i32
    %c0_i32_0 = arith.constant 0 : i32
    %c0_i32_1 = arith.constant 0 : i32
    return %c0_i32, %c0_i32_0 : i32, i32
  }
  func.func @transform_5(%arg0: i32) -> (i32, i32) {
    %c0_i32 = arith.constant 0 : i32
    %c0_i32_0 = arith.constant 0 : i32
    %c0_i32_1 = arith.constant 0 : i32
    return %c0_i32, %c0_i32_0 : i32, i32
  }
  func.func @transform_6(%arg0: i32) -> (i32, i32) {
    %c0_i32 = arith.constant 0 : i32
    %c0_i32_0 = arith.constant 0 : i32
    %c0_i32_1 = arith.constant 0 : i32
    return %c0_i32, %c0_i32_0 : i32, i32
  }
  func.func @transform_7(%arg0: i32) -> (i32, i32) {
    %c0_i32 = arith.constant 0 : i32
    %c0_i32_0 = arith.constant 0 : i32
    return %arg0, %c0_i32 : i32, i32
  }
}

</mosaic_0001>

<bundles_post_ra>
// kernel: simple_net_forward.1
= control target key start
LH: loop header
LB: loop body
LE: loop exit
PB: predicated region body
PF: predicated region fallthrough
CT: control target
= control target key end

     0   :  { %v849_v0 = vmov 1   ;;  %v850_v1 = vmov 0   ;;  %v851_v9 = vmov 2   ;;  %v125_v27 = vlaneseq  ;;  %s1248_s0 = inlined_call_operand.vmem [shape: f32[128,3], index: 0, kind: input, shape index: {}]   ;;  %s1249_s3 = inlined_call_operand.vmem [shape: f32[64,64], index: 3, kind: input, shape index: {}]   ;;  %s1250_s1 = inlined_call_operand.vmem [shape: f32[3,64], index: 1, kind: input, shape index: {}]   ;;  %s1251_s2 = inlined_call_operand.vmem [shape: f32[1,64], index: 2, kind: input, shape index: {}]   ;;  %s1252_s6 = inlined_call_operand.<no memory space> [shape: f32[1,1], index: 6, kind: input, shape index: {}]   ;;  %s1253_s4 = inlined_call_operand.vmem [shape: f32[1,64], index: 4, kind: input, shape index: {}]   ;;  %s1254_s5 = inlined_call_operand.vmem [shape: f32[1,64], index: 5, kind: input, shape index: {}]   ;;  %s1255_s7 = inlined_call_operand.vmem [shape: f32[128,1], index: 7, kind: output, shape index: {}]  }
   0x1   :  { %828 = vset.pattern.permute.xlu1 %v849_v0  ;;  %827 = vset.pattern.permute.xlu0 %v850_v1  ;;  %v28_v2 = vld [vmem:[%s1248_s0] sm:$0xff]  ;;  %v29_v4 = vld [vmem:[%s1248_s0 + $0x8] sm:$0xff]  ;;  %v914_v6 = vld [vmem:[%s1248_s0 + $0x10] sm:$0xff]  ;;  %vm399_vm0 = vcmask 523264   ;;  %vm703_vm1 = vcmask 7168  }
   0x2   :  { %146 = vperm.xlu1 %828, %v28_v2   ;;  %47 = vperm.xlu0 %827, %v28_v2   ;;  %v900_v3 = vld [vmem:[%s1248_s0 + $0x40] sm:$0xff]  ;;  %v37_v5 = vld [vmem:[%s1248_s0 + $0x48] sm:$0xff]  ;;  %v391_v10 = vld [vmem:[%s1249_s3 + $0x38] sm:$0xff]  ;;  %v126_v30 = vshrl.u32 %v125_v27, 7 }
   0x3   :  { %v921_v7 = vld [vmem:[%s1248_s0 + $0x60] sm:$0xff]  ;;  %v927_v8 = vld [vmem:[%s1248_s0 + $0x28] sm:$0xff]  ;;  %768 = vmatprep.subr.mxu0 %v391_v10  ;;  %v390_v11 = vld [vmem:[%s1249_s3 + $0x30] sm:$0xff]  ;;  %808 = vmatprep.subr.mxu1 %v391_v10 }
   0x4   :  { %769 = vmatpush3.msra.mxu0 %v391_v10  ;;  %v940_v12 = vld [vmem:[%s1248_s0 + $0x30] sm:$0xff]  ;;  %v389_v13 = vld [vmem:[%s1249_s3 + $0x28] sm:$0xff]  ;;  %816 = vmatpush3.msra.mxu1 %v391_v10  ;;  %v388_v14 = vld [vmem:[%s1249_s3 + $0x20] sm:$0xff]  ;;  %v211_v33 = vsub.s32 1, %v126_v30  ;;  %v127_v34 = vsub.s32 0, %v126_v30  ;;  %v311_v41 = vsub.s32 2, %v126_v30 }
   0x5   :  { %770 = vmatprep.subr.mxu0 %v390_v11  ;;  %809 = vmatprep.subr.mxu1 %v390_v11  ;;  %v387_v15 = vld [vmem:[%s1249_s3 + $0x18] sm:$0xff]  ;;  %v386_v16 = vld [vmem:[%s1249_s3 + $0x10] sm:$0xff]  ;;  %v385_v18 = vld [vmem:[%s1249_s3 + $0x8] sm:$0xff] }
   0x6   :  { %178 = vperm.xlu1 %828, %v900_v3   ;;  %87 = vperm.xlu0 %827, %v900_v3   ;;  %v38_v17 = vld [vmem:[%s1248_s0 + $0x50] sm:$0xff]  ;;  %v384_v19 = vld [vmem:[%s1249_s3] sm:$0xff]  ;;  %v31_v20 = vld [vmem:[%s1248_s0 + $0x18] sm:$0xff] }
   0x7   :  { %771 = vmatpush3.msra.mxu0 %v390_v11  ;;  %817 = vmatpush3.msra.mxu1 %v390_v11  ;;  %v42_v21 = vld [vmem:[%s1248_s0 + $0x70] sm:$0xff]  ;;  %v39_v22 = vld [vmem:[%s1248_s0 + $0x58] sm:$0xff]  ;;  %v32_v24 = vld [vmem:[%s1248_s0 + $0x20] sm:$0xff] }
   0x8   :  { %772 = vmatprep.subr.mxu0 %v389_v13  ;;  %810 = vmatprep.subr.mxu1 %v389_v13  ;;  %v35_v23 = vld [vmem:[%s1248_s0 + $0x38] sm:$0xff]  ;;  %v41_v26 = vld [vmem:[%s1248_s0 + $0x68] sm:$0xff]  ;;  %v44_v36 = vld [vmem:[%s1250_s1] sm:$0x7] }
   0x9   :  { %773 = vmatpush3.msra.mxu0 %v389_v13  ;;  %818 = vmatpush3.msra.mxu1 %v389_v13  ;;  %v43_v25 = vld [vmem:[%s1248_s0 + $0x78] sm:$0xff]  ;;  %v1014_v38 = vrot.slane %v44_v36, %v211_v33  ;;  %v1016_v39 = vrot.slane %v44_v36, %v127_v34  ;;  %v1022_v46 = vrot.slane %v44_v36, %v311_v41  ;;  %v1030_v51 = vld [vmem:[%s1251_s2] ss:$0 sm:$0xff] }
   0xa   :  { %829 = vset.pattern.permute.xlu1 %v850_v1  ;;  %52 = vperm.xlu0 %827, %v29_v4  }
   0xb   :  { %92 = vperm.xlu1 %829, %v37_v5   ;;  %774 = vmatprep.subr.mxu0 %v388_v14 }
   0xc   :  { %775 = vmatpush3.msra.mxu0 %v388_v14  ;;  %811 = vmatprep.subr.mxu1 %v388_v14 }
   0xd   :  { %776 = vmatprep.subr.mxu0 %v387_v15  ;;  %819 = vmatpush3.msra.mxu1 %v388_v14 }
   0xe   :  { %57 = vperm.xlu0 %827, %v914_v6   ;;  %777 = vmatpush3.msra.mxu0 %v387_v15 }
   0xf   :  { %830 = vset.pattern.permute.xlu1 %v849_v0  ;;  %778 = vmatprep.subr.mxu0 %v386_v16 }
  0x10   :  { %182 = vperm.xlu1 %830, %v37_v5   ;;  %779 = vmatpush3.msra.mxu0 %v386_v16 }
  0x11   :  { %780 = vmatprep.subr.mxu0 %v385_v18  ;;  %812 = vmatprep.subr.mxu1 %v387_v15 }
  0x12   :  { %107 = vperm.xlu0 %827, %v921_v7   ;;  %781 = vmatpush3.msra.mxu0 %v385_v18 }
  0x13   :  { %782 = vmatprep.subr.mxu0 %v384_v19  ;;  %820 = vmatpush3.msra.mxu1 %v387_v15 }
  0x14   :  { %831 = vset.pattern.permute.xlu1 %v851_v9  ;;  %783 = vmatpush3.msra.mxu0 %v384_v19 }
  0x15   :  { %246 = vperm.xlu1 %831, %v28_v2   ;;  %813 = vmatprep.subr.mxu1 %v386_v16 }
  0x16   :  { %72 = vperm.xlu0 %827, %v927_v8   ;;  %821 = vmatpush3.msra.mxu1 %v386_v16 }
  0x17   :  { %814 = vmatprep.subr.mxu1 %v385_v18 }
  0x18   :  { %822 = vmatpush3.msra.mxu1 %v385_v18 }
  0x19   :  { %250 = vperm.xlu1 %831, %v29_v4   ;;  %815 = vmatprep.subr.mxu1 %v384_v19 }
  0x1a   :  { %77 = vperm.xlu0 %827, %v940_v12   ;;  %823 = vmatpush3.msra.mxu1 %v384_v19 }
  0x1d   :  { %282 = vperm.xlu1 %831, %v37_v5  }
  0x1e   :  { %842 = vset.pattern.permute.xlu0 %v849_v0 }
  0x1f   :  { %150 = vperm.xlu0 %842, %v29_v4  }
  0x21   :  { %832 = vset.pattern.permute.xlu1 %v850_v1 }
  0x22   :  { %97 = vperm.xlu1 %832, %v38_v17  }
  0x23   :  { %186 = vperm.xlu0 %842, %v38_v17  }
  0x26   :  { %833 = vset.pattern.permute.xlu1 %v849_v0 }
  0x27   :  { %154 = vperm.xlu1 %833, %v914_v6   ;;  %158 = vperm.xlu0 %842, %v31_v20  }
  0x2b   :  { %834 = vset.pattern.permute.xlu1 %v850_v1  ;;  %166 = vperm.xlu0 %842, %v927_v8  }
  0x2c   :  { %62 = vperm.xlu1 %834, %v31_v20  }
  0x2f   :  { %202 = vperm.xlu0 %842, %v42_v21  }
  0x30   :  { %102 = vperm.xlu1 %834, %v39_v22  }
  0x33   :  { %174 = vperm.xlu0 %842, %v35_v23  }
  0x34   :  { %835 = vset.pattern.permute.xlu1 %v849_v0 }
  0x35   :  { %190 = vperm.xlu1 %835, %v39_v22  }
  0x37   :  { %846 = vset.pattern.permute.xlu0 %v851_v9 }
  0x38   :  { %278 = vperm.xlu0 %846, %v900_v3  }
  0x39   :  { %836 = vset.pattern.permute.xlu1 %v851_v9 }
  0x3a   :  { %286 = vperm.xlu1 %836, %v38_v17  }
  0x3c   :  { %254 = vperm.xlu0 %846, %v914_v6  }
  0x3e   :  { %258 = vperm.xlu1 %836, %v31_v20  }
  0x40   :  { %290 = vperm.xlu0 %846, %v39_v22  }
  0x42   :  { %837 = vset.pattern.permute.xlu1 %v850_v1 }
  0x43   :  { %67 = vperm.xlu1 %837, %v32_v24  }
  0x44   :  { %294 = vperm.xlu0 %846, %v921_v7  }
  0x47   :  { %838 = vset.pattern.permute.xlu1 %v849_v0 }
  0x48   :  { %162 = vperm.xlu1 %838, %v32_v24   ;;  %270 = vperm.xlu0 %846, %v940_v12  }
  0x4c   :  { %194 = vperm.xlu1 %838, %v921_v7   ;;  %306 = vperm.xlu0 %846, %v43_v25  }
  0x50   :  { %839 = vset.pattern.permute.xlu1 %v850_v1 }
  0x51   :  { %112 = vperm.xlu1 %839, %v41_v26  }
  0x55   :  { %840 = vset.pattern.permute.xlu1 %v849_v0 }
  0x56   :  { %198 = vperm.xlu1 %840, %v41_v26  }
  0x5a   :  { %841 = vset.pattern.permute.xlu1 %v851_v9 }
  0x5b   :  { %262 = vperm.xlu1 %841, %v32_v24  }
  0x5f   :  { %266 = vperm.xlu1 %841, %v927_v8  }
  0x63   :  { %298 = vperm.xlu1 %841, %v41_v26  }
  0x67   :  { %843 = vset.pattern.permute.xlu1 %v850_v1 }
  0x68   :  { %117 = vperm.xlu1 %843, %v42_v21  }
  0x6c   :  { %844 = vset.pattern.permute.xlu1 %v849_v0 }
  0x6d   :  { %170 = vperm.xlu1 %844, %v940_v12  }
  0x71   :  { %845 = vset.pattern.permute.xlu1 %v850_v1 }
  0x72   :  { %82 = vperm.xlu1 %845, %v35_v23  }
  0x76   :  { %122 = vperm.xlu1 %845, %v43_v25  }
  0x7a   :  { %847 = vset.pattern.permute.xlu1 %v849_v0 }
  0x7b   :  { %206 = vperm.xlu1 %847, %v43_v25  }
  0x7d   :  { %v147_v28 = vpop.permute.xlu1 %146  ;;  %v48_v29 = vpop.permute.xlu0 %47 }
  0x7e   :  { %v213_v43 = vmul.f32 %v1014_v38, %v147_v28  ;;  %v129_v44 = vmul.f32 %v1016_v39, %v48_v29 }
  0x7f   :  { %848 = vset.pattern.permute.xlu1 %v851_v9 }
  0x80   :  { %302 = vperm.xlu1 %848, %v42_v21   ;;  %v229_v48 = vadd.f32 %v213_v43, %v129_v44 }
  0x81   :  { %v179_v31 = vpop.permute.xlu1 %178  ;;  %v88_v32 = vpop.permute.xlu0 %87 }
  0x82   :  { %v221_v14 = vmul.f32 %v1014_v38, %v179_v31  ;;  %v137_v15 = vmul.f32 %v1016_v39, %v88_v32 }
  0x84   :  { %274 = vperm.xlu1 %848, %v35_v23   ;;  %v237_v22 = vadd.f32 %v221_v14, %v137_v15 }
  0x85   :  { %v53_v35 = vpop.permute.xlu0 %52 }
  0x86   :  { %v93_v37 = vpop.permute.xlu1 %92  ;;  %v130_v58 = vmul.f32 %v1016_v39, %v53_v35 }
  0x87   :  { %v138_v12 = vmul.f32 %v1016_v39, %v93_v37 }
  0x89   :  { %v58_v40 = vpop.permute.xlu0 %57 }
  0x8a   :  { %v131_v23 = vmul.f32 %v1016_v39, %v58_v40 }
  0x8b   :  { %v183_v42 = vpop.permute.xlu1 %182 }
  0x8c   :  { %v222_v10 = vmul.f32 %v1014_v38, %v183_v42 }
  0x8d   :  { %v1020_v45 = vpop.permute.xlu0 %107 }
  0x8e   :  { %v238_v17 = vadd.f32 %v222_v10, %v138_v12 }
  0x90   :  { %v247_v47 = vpop.permute.xlu1 %246 }
  0x91   :  { %v313_v49 = vmul.f32 %v1022_v46, %v247_v47  ;;  %v1025_v50 = vpop.permute.xlu0 %72 }
  0x93   :  { %v329_v52 = vadd.f32 %v313_v49, %v229_v48 }
  0x94   :  { %v251_v53 = vpop.permute.xlu1 %250 }
  0x95   :  { %v1032_v54 = vpop.permute.xlu0 %77  ;;  %v352_v55 = vadd.f32 %v1030_v51, %v329_v52  ;;  %v314_v61 = vmul.f32 %v1022_v46, %v251_v53 }
  0x97   :  { %v368_v56 = vmax.f32 %v352_v55, 0.0 }
  0x98   :  { %v283_v57 = vpop.permute.xlu1 %282 }
  0x99   :  { %784 = vmatprep.mubr.msk.f32.mxu0 %vm399_vm0, %v368_v56  ;;  %v322_v13 = vmul.f32 %v1022_v46, %v283_v57 }
  0x9a   :  { %v151_v59 = vpop.permute.xlu0 %150 }
  0x9b   :  { %v214_v60 = vmul.f32 %v1014_v38, %v151_v59  ;;  %v338_v20 = vadd.f32 %v322_v13, %v238_v17 }
  0x9d   :  { %v230_v62 = vadd.f32 %v214_v60, %v130_v58  ;;  %v98_v63 = vpop.permute.xlu1 %97  ;;  %v361_v32 = vadd.f32 %v1030_v51, %v338_v20 }
  0x9e   :  { %v187_v0 = vpop.permute.xlu0 %186  ;;  %v139_v18 = vmul.f32 %v1016_v39, %v98_v63 }
  0x9f   :  { %v330_v1 = vadd.f32 %v314_v61, %v230_v62  ;;  %v223_v19 = vmul.f32 %v1014_v38, %v187_v0  ;;  %v377_v52 = vmax.f32 %v361_v32, 0.0 }
  0xa1   :  { %v353_v2 = vadd.f32 %v1030_v51, %v330_v1  ;;  %v239_v29 = vadd.f32 %v223_v19, %v139_v18 }
  0xa2   :  { %v155_v3 = vpop.permute.xlu1 %154  ;;  %v159_v4 = vpop.permute.xlu0 %158 }
  0xa3   :  { %v369_v5 = vmax.f32 %v353_v2, 0.0  ;;  %v215_v24 = vmul.f32 %v1014_v38, %v155_v3  ;;  %v216_v26 = vmul.f32 %v1014_v38, %v159_v4 }
  0xa5   :  { %785 = vmatmul.mubr.msk.f32.vlgmr.msra.gmra.mxu0 %vm399_vm0, %v369_v5  ;;  %v231_v35 = vadd.f32 %v215_v24, %v131_v23 }
  0xa6   :  { %v1041_v6 = vpop.permute.xlu0 %166 }
  0xa7   :  { %v63_v7 = vpop.permute.xlu1 %62 }
  0xa8   :  { %v132_v27 = vmul.f32 %v1016_v39, %v63_v7  ;;  %v141_v7 = vmul.f32 %v1016_v39, %v1020_v45  ;;  %v134_v45 = vmul.f32 %v1016_v39, %v1025_v50 }
  0xaa   :  { %v1043_v8 = vpop.permute.xlu0 %202  ;;  %v232_v41 = vadd.f32 %v216_v26, %v132_v27 }
  0xab   :  { %v103_v9 = vpop.permute.xlu1 %102 }
  0xac   :  { %v140_v42 = vmul.f32 %v1016_v39, %v103_v9 }
  0xae   :  { %v1046_v11 = vpop.permute.xlu0 %174 }
  0xb0   :  { %v191_v16 = vpop.permute.xlu1 %190 }
  0xb1   :  { %v224_v33 = vmul.f32 %v1014_v38, %v191_v16 }
  0xb3   :  { %v279_v21 = vpop.permute.xlu0 %278  ;;  %v240_v53 = vadd.f32 %v224_v33, %v140_v42 }
  0xb4   :  { %v321_v25 = vmul.f32 %v1022_v46, %v279_v21  ;;  %v218_v21 = vmul.f32 %v1014_v38, %v1041_v6 }
  0xb5   :  { %v287_v28 = vpop.permute.xlu1 %286 }
  0xb6   :  { %v337_v30 = vadd.f32 %v321_v25, %v237_v22  ;;  %v323_v31 = vmul.f32 %v1022_v46, %v287_v28  ;;  %v234_v26 = vadd.f32 %v218_v21, %v134_v45 }
  0xb7   :  { %v255_v34 = vpop.permute.xlu0 %254 }
  0xb8   :  { %v339_v36 = vadd.f32 %v323_v31, %v239_v29  ;;  %v315_v37 = vmul.f32 %v1022_v46, %v255_v34  ;;  %v360_v40 = vadd.f32 %v1030_v51, %v337_v30 }
  0xb9   :  { %v259_v43 = vpop.permute.xlu1 %258 }
  0xba   :  { %v362_v44 = vadd.f32 %v1030_v51, %v339_v36  ;;  %v331_v47 = vadd.f32 %v315_v37, %v231_v35  ;;  %v316_v48 = vmul.f32 %v1022_v46, %v259_v43  ;;  %v376_v49 = vmax.f32 %v360_v40, 0.0 }
  0xbb   :  { %v291_v55 = vpop.permute.xlu0 %290  ;;  %v135_v43 = vmul.f32 %v1016_v39, %v1032_v54 }
  0xbc   :  { %v378_v56 = vmax.f32 %v362_v44, 0.0  ;;  %v354_v57 = vadd.f32 %v1030_v51, %v331_v47  ;;  %v332_v58 = vadd.f32 %v316_v48, %v232_v41  ;;  %v324_v59 = vmul.f32 %v1022_v46, %v291_v55  ;;  %796 = vmatprep.mubr.msk.f32.mxu1 %vm399_vm0, %v376_v49 }
  0xbd   :  { %797 = vmatmul.mubr.msk.f32.vlgmr.msra.gmra.mxu1 %vm399_vm0, %v377_v52 }
  0xbe   :  { %v370_v60 = vmax.f32 %v354_v57, 0.0  ;;  %v355_v61 = vadd.f32 %v1030_v51, %v332_v58  ;;  %v340_v62 = vadd.f32 %v324_v59, %v240_v53  ;;  %v68_v63 = vpop.permute.xlu1 %67  ;;  %799 = vmatprep.mubr.msk.f32.mxu1 %vm399_vm0, %v378_v56 }
  0xbf   :  { %v295_v4 = vpop.permute.xlu0 %294  ;;  %v133_v19 = vmul.f32 %v1016_v39, %v68_v63 }
  0xc0   :  { %v371_v0 = vmax.f32 %v355_v61, 0.0  ;;  %v363_v1 = vadd.f32 %v1030_v51, %v340_v62  ;;  %787 = vmatprep.mubr.msk.f32.mxu0 %vm399_vm0, %v370_v60  ;;  %v325_v10 = vmul.f32 %v1022_v46, %v295_v4 }
  0xc2   :  { %v379_v2 = vmax.f32 %v363_v1, 0.0  ;;  %788 = vmatmul.mubr.msk.f32.gmra.mxu0 %vm399_vm0, %v371_v0  ;;  %v227_v0 = vmul.f32 %v1014_v38, %v1043_v8 }
  0xc3   :  { %v163_v3 = vpop.permute.xlu1 %162  ;;  %v271_v47 = vpop.permute.xlu0 %270 }
  0xc4   :  { %800 = vmatmul.mubr.msk.f32.gmra.mxu1 %vm399_vm0, %v379_v2  ;;  %v217_v18 = vmul.f32 %v1014_v38, %v163_v3  ;;  %v319_v48 = vmul.f32 %v1022_v46, %v271_v47 }
  0xc6   :  { %v233_v22 = vadd.f32 %v217_v18, %v133_v19  ;;  %v1135_v19 = vld [vmem:[%s1254_s5] ss:$0 sm:$0xff] }
  0xc7   :  { %v195_v5 = vpop.permute.xlu1 %194  ;;  %v307_v58 = vpop.permute.xlu0 %306 }
  0xc8   :  { %v225_v9 = vmul.f32 %v1014_v38, %v195_v5  ;;  %v328_v62 = vmul.f32 %v1022_v46, %v307_v58 }
  0xca   :  { %v241_v12 = vadd.f32 %v225_v9, %v141_v7  ;;  %v220_v7 = vmul.f32 %v1014_v38, %v1046_v11 }
  0xcc   :  { %v341_v13 = vadd.f32 %v325_v10, %v241_v12  ;;  %v113_v14 = vpop.permute.xlu1 %112 }
  0xcd   :  { %v142_v30 = vmul.f32 %v1016_v39, %v113_v14 }
  0xce   :  { %v364_v15 = vadd.f32 %v1030_v51, %v341_v13 }
  0xd0   :  { %v380_v16 = vmax.f32 %v364_v15, 0.0 }
  0xd1   :  { %v199_v17 = vpop.permute.xlu1 %198 }
  0xd2   :  { %802 = vmatprep.mubr.msk.f32.mxu1 %vm399_vm0, %v380_v16  ;;  %v226_v27 = vmul.f32 %v1014_v38, %v199_v17 }
  0xd4   :  { %v242_v33 = vadd.f32 %v226_v27, %v142_v30 }
  0xd6   :  { %v263_v20 = vpop.permute.xlu1 %262 }
  0xd7   :  { %v317_v23 = vmul.f32 %v1022_v46, %v263_v20 }
  0xd9   :  { %v333_v24 = vadd.f32 %v317_v23, %v233_v22 }
  0xda   :  { %v267_v25 = vpop.permute.xlu1 %266 }
  0xdb   :  { %v356_v28 = vadd.f32 %v1030_v51, %v333_v24  ;;  %v318_v29 = vmul.f32 %v1022_v46, %v267_v25 }
  0xdd   :  { %v372_v31 = vmax.f32 %v356_v28, 0.0  ;;  %v334_v32 = vadd.f32 %v318_v29, %v234_v26 }
  0xde   :  { %v299_v50 = vpop.permute.xlu1 %298 }
  0xdf   :  { %v357_v6 = vadd.f32 %v1030_v51, %v334_v32  ;;  %v326_v34 = vmul.f32 %v1022_v46, %v299_v50  ;;  %790 = vmatprep.mubr.msk.f32.mxu0 %vm399_vm0, %v372_v31 }
  0xe1   :  { %v373_v35 = vmax.f32 %v357_v6, 0.0  ;;  %v342_v36 = vadd.f32 %v326_v34, %v242_v33 }
  0xe3   :  { %v365_v37 = vadd.f32 %v1030_v51, %v342_v36  ;;  %v118_v40 = vpop.permute.xlu1 %117  ;;  %791 = vmatmul.mubr.msk.f32.gmra.mxu0 %vm399_vm0, %v373_v35 }
  0xe4   :  { %v143_v61 = vmul.f32 %v1016_v39, %v118_v40 }
  0xe5   :  { %v381_v41 = vmax.f32 %v365_v37, 0.0 }
  0xe6   :  { %v243_v3 = vadd.f32 %v227_v0, %v143_v61 }
  0xe7   :  { %803 = vmatmul.mubr.msk.f32.gmra.mxu1 %vm399_vm0, %v381_v41 }
  0xe8   :  { %v171_v42 = vpop.permute.xlu1 %170 }
  0xe9   :  { %v219_v44 = vmul.f32 %v1014_v38, %v171_v42 }
  0xeb   :  { %v235_v49 = vadd.f32 %v219_v44, %v135_v43 }
  0xed   :  { %v335_v52 = vadd.f32 %v319_v48, %v235_v49  ;;  %v83_v53 = vpop.permute.xlu1 %82 }
  0xee   :  { %v136_v4 = vmul.f32 %v1016_v39, %v83_v53 }
  0xef   :  { %v358_v55 = vadd.f32 %v1030_v51, %v335_v52 }
  0xf0   :  { %v236_v13 = vadd.f32 %v220_v7, %v136_v4 }
  0xf1   :  { %v374_v56 = vmax.f32 %v358_v55, 0.0  ;;  %v123_v57 = vpop.permute.xlu1 %122 }
  0xf2   :  { %v144_v60 = vmul.f32 %v1016_v39, %v123_v57 }
  0xf3   :  { %793 = vmatprep.mubr.msk.f32.mxu0 %vm399_vm0, %v374_v56 }
  0xf6   :  { %v207_v59 = vpop.permute.xlu1 %206 }
  0xf7   :  { %v228_v54 = vmul.f32 %v1014_v38, %v207_v59  ;;  %v12_v38 = vstv %s1252_s6 }
  0xf8   :  { %13 = vst [vmem:[#allocation2] sm:$0x1] %v12_v38 }
  0xf9   :  { %v244_v63 = vadd.f32 %v228_v54, %v144_v60 }
  0xfb   :  { %v344_v1 = vadd.f32 %v328_v62, %v244_v63  ;;  %v303_v2 = vpop.permute.xlu1 %302 }
  0xfc   :  { %v327_v5 = vmul.f32 %v1022_v46, %v303_v2 }
  0xfd   :  { %v367_v10 = vadd.f32 %v1030_v51, %v344_v1 }
  0xfe   :  { %v343_v9 = vadd.f32 %v327_v5, %v243_v3 }
  0xff   :  { %v275_v12 = vpop.permute.xlu1 %274  ;;  %v383_v17 = vmax.f32 %v367_v10, 0.0 }
 0x100   :  { %v366_v14 = vadd.f32 %v1030_v51, %v343_v9  ;;  %v320_v15 = vmul.f32 %v1022_v46, %v275_v12  ;;  %v1129_v46 = vld [vmem:[%s1253_s4] ss:$0 sm:$0xff] }
 0x102   :  { %v382_v8 = vmax.f32 %v366_v14, 0.0  ;;  %v336_v16 = vadd.f32 %v320_v15, %v236_v13 }
 0x104   :  { %v359_v18 = vadd.f32 %v1030_v51, %v336_v16  ;;  %805 = vmatprep.mubr.msk.f32.mxu1 %vm399_vm0, %v382_v8 }
 0x105   :  { %806 = vmatmul.mubr.msk.f32.gmra.mxu1 %vm399_vm0, %v383_v17 }
 0x106   :  { %v375_v39 = vmax.f32 %v359_v18, 0.0 }
 0x108   :  { %794 = vmatmul.mubr.msk.f32.gmra.mxu0 %vm399_vm0, %v375_v39 }
 0x165   :  { %v786_v11 = vpop.f32.mrf.mxu0 }
 0x166   :  { %v520_v51 = vadd.f32 %v786_v11, %v1129_v46 }
 0x167   :  { %v514_v22 = vpop.f32.mrf.mxu0 }
 0x168   :  { %v594_v20 = vmax.f32 %v520_v51, 0.0  ;;  %v515_v23 = vadd.f32 %v1129_v46, %v514_v22 }
 0x16a   :  { %v617_v45 = vmul.f32 %v1135_v19, %v594_v20  ;;  %v593_v27 = vmax.f32 %v515_v23, 0.0 }
 0x16c   :  { %v635_v21 = vsel %vm399_vm0, %v617_v45, 0.0  ;;  %v616_v36 = vmul.f32 %v1135_v19, %v593_v27 }
 0x16d   :  { %636 = vadd.xlane.f32.xlu0 %v635_v21 }
 0x16e   :  { %v632_v49 = vsel %vm399_vm0, %v616_v36, 0.0 }
 0x17d   :  { %v798_v24 = vpop.f32.mrf.mxu1 }
 0x17e   :  { %v560_v25 = vadd.f32 %v798_v24, %v1129_v46 }
 0x17f   :  { %v554_v26 = vpop.f32.mrf.mxu1 }
 0x180   :  { %v602_v28 = vmax.f32 %v560_v25, 0.0  ;;  %v555_v29 = vadd.f32 %v1129_v46, %v554_v26 }
 0x182   :  { %v601_v30 = vmax.f32 %v555_v29, 0.0  ;;  %v789_v31 = vpop.f32.mrf.mxu0  ;;  %v625_v32 = vmul.f32 %v1135_v19, %v602_v28 }
 0x183   :  { %v530_v50 = vadd.f32 %v789_v31, %v1129_v46 }
 0x184   :  { %v524_v33 = vpop.f32.mrf.mxu0  ;;  %v801_v6 = vpop.f32.mrf.mxu1  ;;  %v659_v34 = vsel %vm399_vm0, %v625_v32, 0.0  ;;  %v624_v35 = vmul.f32 %v1135_v19, %v601_v30 }
 0x185   :  { %v596_v37 = vmax.f32 %v530_v50, 0.0  ;;  %v525_v40 = vadd.f32 %v1129_v46, %v524_v33  ;;  %v570_v41 = vadd.f32 %v801_v6, %v1129_v46  ;;  %660 = vadd.xlane.f32.xlu1 %v659_v34  ;;  %v743_v33 = vld [vmem:[#allocation2] ss:$0 sm:$0xff] }
 0x186   :  { %v564_v42 = vpop.f32.mrf.mxu1  ;;  %v656_v43 = vsel %vm399_vm0, %v624_v35, 0.0 }
 0x187   :  { %v595_v44 = vmax.f32 %v525_v40, 0.0  ;;  %v565_v47 = vadd.f32 %v1129_v46, %v564_v42  ;;  %657 = vadd.xlane.f32.xlu0 %v656_v43  ;;  %v604_v48 = vmax.f32 %v570_v41, 0.0  ;;  %v619_v52 = vmul.f32 %v1135_v19, %v596_v37 }
 0x189   :  { %v603_v53 = vmax.f32 %v565_v47, 0.0  ;;  %633 = vadd.xlane.f32.xlu1 %v632_v49  ;;  %v618_v55 = vmul.f32 %v1135_v19, %v595_v44  ;;  %v641_v58 = vsel %vm399_vm0, %v619_v52, 0.0  ;;  %v627_v59 = vmul.f32 %v1135_v19, %v604_v48 }
 0x18b   :  { %v638_v56 = vsel %vm399_vm0, %v618_v55, 0.0  ;;  %v626_v57 = vmul.f32 %v1135_v19, %v603_v53  ;;  %v665_v54 = vsel %vm399_vm0, %v627_v59, 0.0 }
 0x18c   :  { %639 = vadd.xlane.f32.xlu0 %v638_v56 }
 0x18d   :  { %642 = vadd.xlane.f32.xlu1 %v641_v58  ;;  %v662_v60 = vsel %vm399_vm0, %v626_v57, 0.0 }
 0x190   :  { %663 = vadd.xlane.f32.xlu0 %v662_v60 }
 0x191   :  { %666 = vadd.xlane.f32.xlu1 %v665_v54 }
 0x1a3   :  { %v792_v61 = vpop.f32.mrf.mxu0 }
 0x1a4   :  { %v540_v62 = vadd.f32 %v792_v61, %v1129_v46 }
 0x1a5   :  { %v534_v63 = vpop.f32.mrf.mxu0 }
 0x1a6   :  { %v598_v0 = vmax.f32 %v540_v62, 0.0  ;;  %v535_v1 = vadd.f32 %v1129_v46, %v534_v63 }
 0x1a7   :  { %v804_v2 = vpop.f32.mrf.mxu1 }
 0x1a8   :  { %v597_v3 = vmax.f32 %v535_v1, 0.0  ;;  %v580_v4 = vadd.f32 %v804_v2, %v1129_v46  ;;  %v621_v5 = vmul.f32 %v1135_v19, %v598_v0 }
 0x1a9   :  { %v574_v7 = vpop.f32.mrf.mxu1 }
 0x1aa   :  { %v606_v9 = vmax.f32 %v580_v4, 0.0  ;;  %v575_v10 = vadd.f32 %v1129_v46, %v574_v7  ;;  %v647_v12 = vsel %vm399_vm0, %v621_v5, 0.0  ;;  %v620_v13 = vmul.f32 %v1135_v19, %v597_v3 }
 0x1ab   :  { %648 = vadd.xlane.f32.xlu1 %v647_v12 }
 0x1ac   :  { %v605_v14 = vmax.f32 %v575_v10, 0.0  ;;  %v644_v15 = vsel %vm399_vm0, %v620_v13, 0.0  ;;  %v629_v8 = vmul.f32 %v1135_v19, %v606_v9 }
 0x1ad   :  { %645 = vadd.xlane.f32.xlu0 %v644_v15 }
 0x1ae   :  { %v671_v16 = vsel %vm399_vm0, %v629_v8, 0.0  ;;  %v628_v17 = vmul.f32 %v1135_v19, %v605_v14 }
 0x1af   :  { %672 = vadd.xlane.f32.xlu1 %v671_v16 }
 0x1b0   :  { %v668_v18 = vsel %vm399_vm0, %v628_v17, 0.0 }
 0x1b1   :  { %669 = vadd.xlane.f32.xlu0 %v668_v18 }
 0x1c5   :  { %v807_v39 = vpop.f32.mrf.mxu1 }
 0x1c6   :  { %v590_v38 = vadd.f32 %v807_v39, %v1129_v46 }
 0x1c7   :  { %v584_v11 = vpop.f32.mrf.mxu1 }
 0x1c8   :  { %v795_v51 = vpop.f32.mrf.mxu0  ;;  %v585_v20 = vadd.f32 %v1129_v46, %v584_v11  ;;  %v608_v22 = vmax.f32 %v590_v38, 0.0 }
 0x1c9   :  { %v550_v45 = vadd.f32 %v795_v51, %v1129_v46 }
 0x1ca   :  { %v544_v21 = vpop.f32.mrf.mxu0  ;;  %v607_v25 = vmax.f32 %v585_v20, 0.0  ;;  %v631_v30 = vmul.f32 %v1135_v19, %v608_v22 }
 0x1cb   :  { %v600_v23 = vmax.f32 %v550_v45, 0.0  ;;  %v545_v24 = vadd.f32 %v1129_v46, %v544_v21 }
 0x1cc   :  { %v630_v32 = vmul.f32 %v1135_v19, %v607_v25  ;;  %v677_v50 = vsel %vm399_vm0, %v631_v30, 0.0 }
 0x1cd   :  { %v599_v26 = vmax.f32 %v545_v24, 0.0  ;;  %v623_v27 = vmul.f32 %v1135_v19, %v600_v23 }
 0x1ce   :  { %v674_v46 = vsel %vm399_vm0, %v630_v32, 0.0 }
 0x1cf   :  { %v653_v28 = vsel %vm399_vm0, %v623_v27, 0.0  ;;  %v622_v29 = vmul.f32 %v1135_v19, %v599_v26 }
 0x1d0   :  { %654 = vadd.xlane.f32.xlu1 %v653_v28 }
 0x1d1   :  { %v650_v31 = vsel %vm399_vm0, %v622_v29, 0.0 }
 0x1d2   :  { %651 = vadd.xlane.f32.xlu0 %v650_v31 }
 0x1d4   :  { %678 = vadd.xlane.f32.xlu1 %v677_v50 }
 0x1d6   :  { %675 = vadd.xlane.f32.xlu0 %v674_v46 }
 0x1f6   :  { %v637_v6 = vpop.xlane.xlu0 %636 }
 0x1f7   :  { %v688_v34 = vadd.f32 %v743_v33, %v637_v6 }
 0x1f9   :  { %705 = vst.msk [vmem:[%s1255_s7 + $0x8] sm:$0xff] %vm703_vm1, %v688_v34 }
 0x20e   :  { %v661_v35 = vpop.xlane.xlu1 %660 }
 0x20f   :  { %v696_v36 = vadd.f32 %v743_v33, %v661_v35 }
 0x210   :  { %v658_v37 = vpop.xlane.xlu0 %657 }
 0x211   :  { %713 = vst.msk [vmem:[%s1255_s7 + $0x48] sm:$0xff] %vm703_vm1, %v696_v36  ;;  %v695_v19 = vadd.f32 %v743_v33, %v658_v37 }
 0x212   :  { %v634_v40 = vpop.xlane.xlu1 %633 }
 0x213   :  { %712 = vst.msk [vmem:[%s1255_s7 + $0x40] sm:$0xff] %vm703_vm1, %v695_v19  ;;  %v687_v41 = vadd.f32 %v743_v33, %v634_v40 }
 0x215   :  { %704 = vst.msk [vmem:[%s1255_s7] sm:$0xff] %vm703_vm1, %v687_v41  ;;  %v640_v42 = vpop.xlane.xlu0 %639 }
 0x216   :  { %v689_v43 = vadd.f32 %v743_v33, %v640_v42  ;;  %v643_v44 = vpop.xlane.xlu1 %642 }
 0x217   :  { %v690_v47 = vadd.f32 %v743_v33, %v643_v44 }
 0x218   :  { %706 = vst.msk [vmem:[%s1255_s7 + $0x10] sm:$0xff] %vm703_vm1, %v689_v43 }
 0x219   :  { %707 = vst.msk [vmem:[%s1255_s7 + $0x18] sm:$0xff] %vm703_vm1, %v690_v47  ;;  %v664_v48 = vpop.xlane.xlu0 %663 }
 0x21a   :  { %v697_v49 = vadd.f32 %v743_v33, %v664_v48  ;;  %v667_v52 = vpop.xlane.xlu1 %666 }
 0x21b   :  { %v698_v53 = vadd.f32 %v743_v33, %v667_v52 }
 0x21c   :  { %714 = vst.msk [vmem:[%s1255_s7 + $0x50] sm:$0xff] %vm703_vm1, %v697_v49 }
 0x21d   :  { %715 = vst.msk [vmem:[%s1255_s7 + $0x58] sm:$0xff] %vm703_vm1, %v698_v53 }
 0x234   :  { %v649_v55 = vpop.xlane.xlu1 %648 }
 0x235   :  { %v692_v56 = vadd.f32 %v743_v33, %v649_v55 }
 0x236   :  { %v646_v57 = vpop.xlane.xlu0 %645 }
 0x237   :  { %709 = vst.msk [vmem:[%s1255_s7 + $0x28] sm:$0xff] %vm703_vm1, %v692_v56  ;;  %v691_v58 = vadd.f32 %v743_v33, %v646_v57 }
 0x238   :  { %v673_v59 = vpop.xlane.xlu1 %672 }
 0x239   :  { %708 = vst.msk [vmem:[%s1255_s7 + $0x20] sm:$0xff] %vm703_vm1, %v691_v58  ;;  %v700_v60 = vadd.f32 %v743_v33, %v673_v59 }
 0x23a   :  { %v670_v54 = vpop.xlane.xlu0 %669 }
 0x23b   :  { %717 = vst.msk [vmem:[%s1255_s7 + $0x68] sm:$0xff] %vm703_vm1, %v700_v60  ;;  %v699_v61 = vadd.f32 %v743_v33, %v670_v54 }
 0x23d   :  { %716 = vst.msk [vmem:[%s1255_s7 + $0x60] sm:$0xff] %vm703_vm1, %v699_v61 }
 0x259   :  { %v655_v62 = vpop.xlane.xlu1 %654 }
 0x25a   :  { %v694_v63 = vadd.f32 %v743_v33, %v655_v62 }
 0x25b   :  { %v652_v0 = vpop.xlane.xlu0 %651 }
 0x25c   :  { %711 = vst.msk [vmem:[%s1255_s7 + $0x38] sm:$0xff] %vm703_vm1, %v694_v63  ;;  %v693_v1 = vadd.f32 %v743_v33, %v652_v0 }
 0x25d   :  { %v679_v2 = vpop.xlane.xlu1 %678 }
 0x25e   :  { %710 = vst.msk [vmem:[%s1255_s7 + $0x30] sm:$0xff] %vm703_vm1, %v693_v1  ;;  %v702_v3 = vadd.f32 %v743_v33, %v679_v2 }
 0x25f   :  { %v676_v4 = vpop.xlane.xlu0 %675 }
 0x260   :  { %719 = vst.msk [vmem:[%s1255_s7 + $0x78] sm:$0xff] %vm703_vm1, %v702_v3  ;;  %v701_v5 = vadd.f32 %v743_v33, %v676_v4 }
 0x262   :  { %718 = vst.msk [vmem:[%s1255_s7 + $0x70] sm:$0xff] %vm703_vm1, %v701_v5 }

</bundles_post_ra>
